<compile_context>
chip_gen: v7x
topology: tpu7x:2x2x1
jax: 0.10.0
libtpu: 0.0.40
codegen_flags: <defaults>
</compile_context>

<pallas_src>
import jax
import jax.numpy as jnp
from jax.experimental import pallas as pl
from jax.experimental.pallas import tpu as pltpu

_LANES = 128  # vreg lane width; slab last dim is exactly this.


def _single_neuron_kernel(x_ref, w_ref, b_ref, o_ref):
    # Scalars read once from SMEM; multiply-add runs on the VPU and co-issues
    # with the tile loads/stores (kernel stays HBM-bound).
    w = w_ref[0]
    b = b_ref[0]
    x = x_ref[...].astype(jnp.float32)
    o_ref[...] = (x * w + b).astype(o_ref.dtype)


def _round_up(x, m):
    return ((x + m - 1) // m) * m


def _default_tile_rows():
    """Pick tile rows per TPU generation (v7x has only 64 MiB VMEM per TC)."""
    vmem_bytes = 64 * 1024 * 1024  # conservative default (v7x-sized)
    try:
        info = pltpu.get_tpu_info()
        vmem_bytes = getattr(info, "vmem_capacity_bytes", vmem_bytes)
    except Exception:
        pass
    if vmem_bytes <= 64 * 1024 * 1024:
        # v7x: (2048, 128) f32 = 1 MiB/buffer; double-buffered in + out = 4 MiB.
        return 2048
    # v5e / v6e (128 MiB physical): (4096, 128) f32 = 2 MiB/buffer, 8 MiB total
    # double-buffered -- amortizes the ~0.35 us per-grid-step overhead further.
    return 4096


def single_neuron_perceptron(x, weight, bias, *,
                             min_pallas_elements=65536,
                             tile_rows=None):
    """Forward pass of nn.Linear(1, 1) applied to x of shape (..., 1).

    Preserves the input dtype (like PyTorch). Below `min_pallas_elements`
    the plain-JAX fused path is used (a Pallas call is pure overhead at tiny
    sizes); pass 0 to force the Pallas kernel.
    """
    orig_shape = x.shape
    dtype = x.dtype
    w = jnp.asarray(weight, jnp.float32).reshape(-1)[:1]  # (1,) scalar weight
    b = jnp.asarray(bias, jnp.float32).reshape(-1)[:1]    # (1,) scalar bias

    n = x.size
    if n == 0 or n < min_pallas_elements:
        # Tiny-batch fallback: let XLA fuse the scalar multiply-add.
        y = x.astype(jnp.float32) * w[0] + b[0]
        return y.astype(dtype).reshape(orig_shape)

    # --- Lane-dense slab: flatten, pad to a multiple of 128 (only if needed),
    # --- reshape to (rows, 128). Reshape is free for contiguous data.
    flat = x.reshape(-1)
    rows = pl.cdiv(n, _LANES)
    padded_n = rows * _LANES
    if padded_n != n:
        flat = jnp.pad(flat, (0, padded_n - n))
    slab = flat.reshape(rows, _LANES)

    # Tile rows: biggest that fits comfortably in VMEM, multiple of 8 sublanes,
    # clamped so small inputs run in a single grid step.
    max_tr = tile_rows if tile_rows is not None else _default_tile_rows()
    max_tr = max(8, _round_up(max_tr, 8))
    tr = min(max_tr, _round_up(rows, 8))

    # Non-divisible grids are fine: Pallas masks the ragged tail of the last
    # block, so we never pad rows (avoids an extra full HBM copy).
    grid = (pl.cdiv(rows, tr),)

    out_slab = pl.pallas_call(
        _single_neuron_kernel,
        out_shape=jax.ShapeDtypeStruct((rows, _LANES), dtype),
        grid=grid,
        in_specs=[
            # x tile: lane-dense, auto double-buffered / DMA-pipelined.
            pl.BlockSpec((tr, _LANES), lambda i: (i, 0)),
            # scalar weight / bias live in SMEM for the whole kernel.
            pl.BlockSpec(memory_space=pltpu.MemorySpace.SMEM),
            pl.BlockSpec(memory_space=pltpu.MemorySpace.SMEM),
        ],
        out_specs=pl.BlockSpec((tr, _LANES), lambda i: (i, 0)),
        compiler_params=pltpu.CompilerParams(
            # Row tiles are independent -> shard across v7x's two TensorCores.
            dimension_semantics=("parallel",),
            vmem_limit_bytes=32 * 1024 * 1024,
        ),
    )(slab, w, b)

    out = out_slab.reshape(-1)
    if padded_n != n:
        out = out[:n]
    return out.reshape(orig_shape)


if __name__ == "__main__":
    key = jax.random.PRNGKey(0)
    kx, kw, kb, kx2, kx3 = jax.random.split(key, 5)

    # Deterministic parameter init mimicking nn.Linear(1, 1) default
    # (uniform in [-1/sqrt(in_features), 1/sqrt(in_features)] = [-1, 1]).
    weight = jax.random.uniform(kw, (1, 1), jnp.float32, minval=-1.0, maxval=1.0)
    bias = jax.random.uniform(kb, (1,), jnp.float32, minval=-1.0, maxval=1.0)

    # Case 1: small batch (8, 1); force the Pallas path so the kernel runs
    # (rows=1 < 8-row block -> exercises the partial-block masking path).
    x = jax.random.normal(kx, (8, 1), jnp.float32)
    out = single_neuron_perceptron(x, weight, bias, min_pallas_elements=0)
    out = jax.block_until_ready(out)
    ref = x @ weight.T + bias
    assert out.shape == x.shape
    assert out.dtype == x.dtype
    assert jnp.allclose(out, ref, atol=1e-6), "mismatch vs reference (case 1)"

    # Case 2: multi-step grid + padding + ragged last block:
    # 2600 elements -> 21 rows (padded slab 2688), tile_rows=8 -> grid=(3,),
    # last block covers rows 16..23 but only 16..20 exist (masked writeback).
    x2 = jax.random.normal(kx2, (2600, 1), jnp.float32)
    out2 = single_neuron_perceptron(x2, weight, bias,
                                    min_pallas_elements=0, tile_rows=8)
    out2 = jax.block_until_ready(out2)
    ref2 = x2 @ weight.T + bias
    assert out2.shape == x2.shape
    assert jnp.allclose(out2, ref2, atol=1e-6), "mismatch vs reference (case 2)"

    # Case 3: element count divisible by 128 -> zero-copy path (no pad, no
    # output slice), multiple grid steps.
    x3 = jax.random.normal(kx3, (4096, 1), jnp.float32)
    out3 = single_neuron_perceptron(x3, weight, bias,
                                    min_pallas_elements=0, tile_rows=8)
    out3 = jax.block_until_ready(out3)
    ref3 = x3 @ weight.T + bias
    assert out3.shape == x3.shape
    assert jnp.allclose(out3, ref3, atol=1e-6), "mismatch vs reference (case 3)"

    print("KERNEL_OK")
</pallas_src>

<mosaic_0001>
module attributes {stable_mosaic.version = 11 : i64} {
  func.func @_single_neuron_kernel(%arg0: i32, %arg1: memref<8x128xf32, #tpu.memory_space<vmem>>, %arg2: memref<1xf32, #tpu.memory_space<smem>>, %arg3: memref<1xf32, #tpu.memory_space<smem>>, %arg4: memref<8x128xf32, #tpu.memory_space<vmem>>) attributes {dimension_semantics = [#tpu.dimension_semantics<parallel>], iteration_bounds = array<i64: 1>, scalar_prefetch = 0 : i64, scratch_operands = 0 : i64, tpu.core_type = #tpu.core_type<tc>, window_params = [{transform_indices = @transform_0, window_bounds = array<i64: 8, 128>}, {transform_indices = @transform_1, window_bounds = array<i64: 1>}, {transform_indices = @transform_2, window_bounds = array<i64: 1>}, {transform_indices = @transform_3, window_bounds = array<i64: 8, 128>}]} {
    %c0 = arith.constant 0 : index
    %0 = memref.load %arg2[%c0] : memref<1xf32, #tpu.memory_space<smem>>
    %c0_0 = arith.constant 0 : index
    %1 = memref.load %arg3[%c0_0] : memref<1xf32, #tpu.memory_space<smem>>
    %c0_1 = arith.constant 0 : index
    %c0_2 = arith.constant 0 : index
    %2 = vector.load %arg1[%c0_1, %c0_2] : memref<8x128xf32, #tpu.memory_space<vmem>>, vector<8x128xf32>
    %3 = vector.broadcast %0 : f32 to vector<8x128xf32>
    %4 = arith.mulf %2, %3 : vector<8x128xf32>
    %5 = vector.broadcast %1 : f32 to vector<8x128xf32>
    %6 = arith.addf %4, %5 : vector<8x128xf32>
    %c0_3 = arith.constant 0 : index
    %c0_4 = arith.constant 0 : index
    %7 = vector.load %arg4[%c0_3, %c0_4] : memref<8x128xf32, #tpu.memory_space<vmem>>, vector<8x128xf32>
    tpu.vector_store %arg4[%c0_3, %c0_4], %6 {strides = array<i32>} : memref<8x128xf32, #tpu.memory_space<vmem>>, vector<8x128xf32>,
    return
  }
  func.func @transform_0(%arg0: i32) -> (i32, i32) {
    %c0_i32 = arith.constant 0 : i32
    %c0_i32_0 = arith.constant 0 : i32
    return %arg0, %c0_i32 : i32, i32
  }
  func.func @transform_1(%arg0: i32) -> i32 {
    %c0_i32 = arith.constant 0 : i32
    %c0_i32_0 = arith.constant 0 : i32
    return %c0_i32 : i32
  }
  func.func @transform_2(%arg0: i32) -> i32 {
    %c0_i32 = arith.constant 0 : i32
    %c0_i32_0 = arith.constant 0 : i32
    return %c0_i32 : i32
  }
  func.func @transform_3(%arg0: i32) -> (i32, i32) {
    %c0_i32 = arith.constant 0 : i32
    %c0_i32_0 = arith.constant 0 : i32
    return %arg0, %c0_i32 : i32, i32
  }
}

</mosaic_0001>

<bundles_post_ra>
// kernel: tpu_custom_call.1
= control target key start
LH: loop header
LB: loop body
LE: loop exit
PB: predicated region body
PF: predicated region fallthrough
CT: control target
= control target key end

     0   :  { %10 = vsyncpa [#allocation5], 0  ;;  %s112_s0 = inlined_call_operand.vmem [shape: f32[1,128], index: 0, kind: input, shape index: {}]   ;;  %s113_s1 = inlined_call_operand.<no memory space> [shape: f32[1], index: 1, kind: input, shape index: {}]   ;;  %s114_s2 = inlined_call_operand.<no memory space> [shape: f32[1], index: 2, kind: input, shape index: {}]   ;;  %s115_s3 = inlined_call_operand.hbm [shape: f32[1,128], index: 3, kind: output, shape index: {}]  }
   0x1   :  { %v19_v0 = vld [vmem:[%s112_s0] sm:$0xff]  ;;  %v20_v1 = vstv %s113_s1  ;;  %v22_v2 = vstv %s114_s2 }
   0x2   :  { %v21_v3 = vmul.f32 %v20_v1, %v19_v0 }
   0x4   :  { %v23_v4 = vadd.f32 %v22_v2, %v21_v3 }
   0x6   :  { %24 = vst [vmem:[#allocation4] sm:$0xff] %v23_v4 }
   0x7   :  { %29 = vsyncadd [#allocation5], 112  ;;  %s68_s18 = smov [#allocation4]  }
   0x8   :  { %s30_s19 = sshll.u32 %s68_s18, 4  ;;  %s31_s19 = int_to_ptr.vmem [resolvable:$true] %s30_s19 }
   0x9   :  { %s44_s20 = scalar_lea.vmem %s31_s19, 16  ;;  %s48_s21 = scalar_lea.vmem %s31_s19, 128 }
   0xa   :  { %p45_p0 = scmp.ne.s32.totalorder %s31_s19, %s44_s20  ;;  %p49_p1 = scmp.lt.s32.totalorder %s31_s19, %s31_s19 }
   0xb   :  { %p50_p2 = scmp.lt.s32.totalorder %s48_s21, %s44_s20 }
   0xd   :  { %p51_p3 = por %p50_p2, %p49_p1 }
   0xf   :  { %p52_p4 = pnand %p51_p3, %p45_p0 }
  0x11   :  { %55 = shalt.err (!%p52_p4)
}
  0x12   :  { %s56_s22 = scalar_lea.hbm %s115_s3, 16 }
  0x13   :  { %p57_p5 = scmp.ne.s32.totalorder %s115_s3, %s56_s22  ;;  %p60_p6 = scmp.lt.u32.totalorder %s56_s22, %s115_s3 }
  0x15   :  { %p62_p7 = pnand %p60_p6, %p57_p5 }
  0x17   :  { %65 = shalt.err (!%p62_p7)
}
  0x18   :  { %s69_s26 = smov 16   ;;  %s70_s27 = smov 1  }
  0x19   :  { %36 = dma.vmem_to_hbm [thread:$0]  %s31_s19, 16, %s115_s3, [#allocation5], %s69_s26, %s69_s26, %s70_s27  }
  0x1a   :  { %66 = dma.done.wait [#allocation5], 128  }
  0x1b   :  { %67 = vsyncadd [#allocation5], 4294967168 }
  0x1c   :  { %40 = vsyncpa [#allocation5], 1 }

</bundles_post_ra>
